<compile_context>
chip_gen: v5e
topology: v5e:2x2
jax: 0.10.0
libtpu: 0.0.40
codegen_flags: <defaults>
</compile_context>

<pallas_src>
import functools

import jax
import jax.numpy as jnp
from jax.experimental import pallas as pl
from jax.experimental.pallas import tpu as pltpu

EPS = 1e-5


def _bn_scale_shift(h, gamma, beta, n_valid, n_padrows, pad_row):
    """Training-mode BatchNorm1d over the valid rows of (N, F) `h`, returned as a
    (scale, shift) pair to be folded into the downstream weights.

    Padded rows are removed analytically: every padded row of `h` equals
    `pad_row`, so its contribution is subtracted from sum / sum-of-squares
    instead of materializing an (N, F) mask (saves two full-tensor multiplies).
    """
    s = jnp.sum(h, axis=0, keepdims=True)
    sq = jnp.sum(h * h, axis=0, keepdims=True)
    if n_padrows:
        s = s - float(n_padrows) * pad_row
        sq = sq - float(n_padrows) * (pad_row * pad_row)
    inv_n = 1.0 / float(n_valid)
    mean = s * inv_n
    # One-pass biased variance; clamp cancellation.  For bit-tight agreement with
    # torch on huge/large-magnitude batches a centered second pass would be needed.
    var = jnp.maximum(sq * inv_n - mean * mean, 0.0)
    scale = jax.lax.rsqrt(var + EPS) * gamma          # (1, F)
    shift = beta - mean * scale                       # (1, F)
    return scale, shift


def shallow_nn_kernel(x_ref, w1_ref, w2t_ref, p1_ref, p2_ref, p3_ref, out_ref,
                      *, n_valid, n_pad):
    f32, bf16 = jnp.float32, jnp.bfloat16
    n_padrows = n_pad - n_valid

    p1 = p1_ref[...]                       # (3, 64) f32: [b1; gamma1; beta1]
    p2 = p2_ref[...]                       # (3, 32) f32: [b2; gamma2; beta2]
    p3 = p3_ref[...]                       # (2, 32) f32: [w3 row; b3 broadcast]
    b1, g1, be1 = p1[0:1, :], p1[1:2, :], p1[2:3, :]
    b2, g2, be2 = p2[0:1, :], p2[1:2, :], p2[2:3, :]
    w3r = p3[0:1, :]
    w2t = w2t_ref[...]                     # (32, 64) f32 = W2^T

    dnums = (((1,), (1,)), ((), ()))       # contract the trailing dim of both operands

    # ---- Linear(D, 64) on the MXU (bf16 x bf16 -> f32) + ReLU -----------------
    h1 = jnp.dot(x_ref[...], w1_ref[...], preferred_element_type=f32)
    h1 = jnp.maximum(h1 + b1, 0.0)                                    # (n_pad, 64) f32

    # ---- BatchNorm1d(64), folded into layer-2's weights -----------------------
    # Padded x rows are all-zero, so every padded h1 row is exactly relu(b1).
    r1 = jnp.maximum(b1, 0.0) if n_padrows else None
    scale1, shift1 = _bn_scale_shift(h1, g1, be1, n_valid, n_padrows, r1)
    w2t_eff = (w2t * scale1).astype(bf16)                              # scale W2 rows
    # b2_eff = shift1 @ W2 + b2 via a tiny (8,64)x(32,64)^T MXU matmul (row 0 used).
    shift1_8 = jnp.broadcast_to(shift1, (8, shift1.shape[-1]))
    b2_eff = jax.lax.dot_general(shift1_8, w2t, dnums,
                                 preferred_element_type=f32)[0:1, :] + b2

    # ---- Linear(64, 32) + ReLU (BN1 already folded into w2t_eff / b2_eff) -----
    h2 = jax.lax.dot_general(h1.astype(bf16), w2t_eff, dnums,
                             preferred_element_type=f32)
    h2 = jnp.maximum(h2 + b2_eff, 0.0)                                 # (n_pad, 32) f32

    # ---- BatchNorm1d(32), folded into the final layer -------------------------
    if n_padrows:
        # Every padded h2 row equals relu(BN1(relu(b1)) @ W2 + b2): one (1,32) row.
        a1_pad_8 = jnp.broadcast_to(r1 * scale1 + shift1, (8, shift1.shape[-1]))
        z2_pad = jax.lax.dot_general(a1_pad_8, w2t, dnums,
                                     preferred_element_type=f32)[0:1, :] + b2
        r2 = jnp.maximum(z2_pad, 0.0)
    else:
        r2 = None
    scale2, shift2 = _bn_scale_shift(h2, g2, be2, n_valid, n_padrows, r2)
    w3_eff = w3r * scale2                                              # (1, 32)
    b3_eff = jnp.sum(shift2 * w3r, axis=-1, keepdims=True) + p3[1:2, 0:1]  # (1, 1)

    # ---- Linear(32, 1) as a lane-dense (1, n_pad) contraction ------------------
    # (avoids the maximally lane-sparse (n_pad, 1) column output / masked stores)
    lhs8 = jnp.broadcast_to(w3_eff, (8, w3_eff.shape[-1])).astype(bf16)
    y = jax.lax.dot_general(lhs8, h2.astype(bf16), dnums,
                            preferred_element_type=f32)               # (8, n_pad)
    out_ref[...] = (y[0:1, :] + b3_eff).astype(out_ref.dtype)


def _vmem_limit_bytes():
    # Per-generation budget: ~75% of physical VMEM, capped at 100 MiB.
    # v5e/v6e (128 MiB) -> 96 MiB; v7x (64 MiB per TensorCore) -> 48 MiB.
    try:
        cap = int(pltpu.get_tpu_info().vmem_capacity_bytes)
    except Exception:  # pragma: no cover - conservative fallback
        cap = 64 * 1024 * 1024
    return max(32 * 1024 * 1024, min(cap * 3 // 4, 100 * 1024 * 1024))


def pack_params(params):
    """Torch-style f32 params -> kernel-ready packed params."""
    w1, b1, g1, be1, w2, b2, g2, be2, w3, b3 = params
    p1 = jnp.concatenate([b1, g1, be1], axis=0)                       # (3, 64) f32
    p2 = jnp.concatenate([b2, g2, be2], axis=0)                       # (3, 32) f32
    w3_row = w3.reshape(1, -1)                                        # (1, 32) f32
    b3_row = jnp.broadcast_to(b3.reshape(1, 1), (1, w3.shape[0]))     # (1, 32) f32
    p3 = jnp.concatenate([w3_row, b3_row], axis=0)                    # (2, 32) f32
    # W1 bf16 (MXU operand); W2 transposed + f32 so the in-kernel BN1 fold is a
    # plain lane-broadcast multiply before the bf16 re-cast.
    return (w1.astype(jnp.bfloat16), jnp.transpose(w2), p1, p2, p3)


def shallow_nn_forward(x, packed):
    w1, w2t, p1, p2, p3 = packed
    n, _ = x.shape
    # Round the batch to a multiple of 128 so the (1, n_pad) output is lane-dense
    # (unmasked vector stores) and the bf16 x tile is sublane-friendly.
    n_pad = max(128, ((n + 127) // 128) * 128)
    pad = n_pad - n

    x_b = x.astype(jnp.bfloat16)           # halve x HBM->VMEM bytes; matmul is bf16
    if pad:
        x_b = jnp.pad(x_b, ((0, pad), (0, 0)))

    def full_spec(shape):
        return pl.BlockSpec(shape, lambda: tuple(0 for _ in shape))

    kernel = functools.partial(shallow_nn_kernel, n_valid=n, n_pad=n_pad)
    args = (x_b, w1, w2t, p1, p2, p3)
    out = pl.pallas_call(
        kernel,
        out_shape=jax.ShapeDtypeStruct((1, n_pad), jnp.float32),
        in_specs=[full_spec(a.shape) for a in args],
        out_specs=full_spec((1, n_pad)),
        compiler_params=pltpu.CompilerParams(vmem_limit_bytes=_vmem_limit_bytes()),
    )(*args)
    return out[0, :n].reshape(n, 1)


def init_params(key, input_dim):
    # PyTorch-style init: Linear W,b ~ U(-1/sqrt(fan_in), +1/sqrt(fan_in)),
    # weights stored transposed as (in, out); BatchNorm gamma=1, beta=0.
    ks = jax.random.split(key, 6)

    def lin(kw, kb, fan_in, fan_out):
        bound = 1.0 / (fan_in ** 0.5)
        w = jax.random.uniform(kw, (fan_in, fan_out), jnp.float32, -bound, bound)
        b = jax.random.uniform(kb, (1, fan_out), jnp.float32, -bound, bound)
        return w, b

    w1, b1 = lin(ks[0], ks[1], input_dim, 64)
    w2, b2 = lin(ks[2], ks[3], 64, 32)
    w3, b3 = lin(ks[4], ks[5], 32, 1)
    g1 = jnp.ones((1, 64), jnp.float32)
    be1 = jnp.zeros((1, 64), jnp.float32)
    g2 = jnp.ones((1, 32), jnp.float32)
    be2 = jnp.zeros((1, 32), jnp.float32)
    return (w1, b1, g1, be1, w2, b2, g2, be2, w3, b3)


def _bn_ref(h, g, be):
    m = h.mean(0, keepdims=True)
    v = ((h - m) ** 2).mean(0, keepdims=True)
    return (h - m) * jax.lax.rsqrt(v + EPS) * g + be


def reference_forward_f32(x, params):
    """Pure f32 reference (exact PyTorch training-mode semantics)."""
    w1, b1, g1, be1, w2, b2, g2, be2, w3, b3 = params
    h = jnp.maximum(x @ w1 + b1, 0.0)
    h = _bn_ref(h, g1, be1)
    h = jnp.maximum(h @ w2 + b2, 0.0)
    h = _bn_ref(h, g2, be2)
    return h @ w3 + b3


def reference_forward_bf16(x, params):
    """Reference mirroring bf16 matmul operands / f32 accumulation."""
    w1, b1, g1, be1, w2, b2, g2, be2, w3, b3 = params
    h = jnp.dot(x.astype(jnp.bfloat16), w1.astype(jnp.bfloat16),
                preferred_element_type=jnp.float32) + b1
    h = _bn_ref(jnp.maximum(h, 0.0), g1, be1)
    h = jnp.dot(h.astype(jnp.bfloat16), w2.astype(jnp.bfloat16),
                preferred_element_type=jnp.float32) + b2
    h = _bn_ref(jnp.maximum(h, 0.0), g2, be2)
    return h @ w3 + b3


if __name__ == "__main__":
    key = jax.random.PRNGKey(0)
    k_x1, k_x2, k_p = jax.random.split(key, 3)

    input_dim = 16
    params = init_params(k_p, input_dim)
    packed = pack_params(params)

    # Case 1: ragged batch (exercises the analytic pad-row BN correction).
    x1 = jax.random.normal(k_x1, (37, input_dim), jnp.float32)
    out1 = jax.block_until_ready(shallow_nn_forward(x1, packed))
    assert out1.shape == (37, 1)
    assert jnp.allclose(out1, reference_forward_bf16(x1, params), atol=2.5e-2, rtol=2.5e-2)
    assert jnp.allclose(out1, reference_forward_f32(x1, params), atol=1e-1, rtol=1e-1)

    # Case 2: lane-aligned batch (no pad rows, no correction path).
    x2 = jax.random.normal(k_x2, (128, input_dim), jnp.float32)
    out2 = jax.block_until_ready(shallow_nn_forward(x2, packed))
    assert out2.shape == (128, 1)
    assert jnp.allclose(out2, reference_forward_bf16(x2, params), atol=2.5e-2, rtol=2.5e-2)
    assert jnp.allclose(out2, reference_forward_f32(x2, params), atol=1e-1, rtol=1e-1)

    print("KERNEL_OK")
</pallas_src>

<mosaic_0001>
module attributes {stable_mosaic.version = 11 : i64} {
  func.func @shallow_nn_kernel(%arg0: memref<128x16xbf16, #tpu.memory_space<vmem>>, %arg1: memref<16x64xbf16, #tpu.memory_space<vmem>>, %arg2: memref<32x64xf32, #tpu.memory_space<vmem>>, %arg3: memref<3x64xf32, #tpu.memory_space<vmem>>, %arg4: memref<3x32xf32, #tpu.memory_space<vmem>>, %arg5: memref<2x32xf32, #tpu.memory_space<vmem>>, %arg6: memref<1x128xf32, #tpu.memory_space<vmem>>) attributes {dimension_semantics = [], scalar_prefetch = 0 : i64, scratch_operands = 0 : i64, tpu.core_type = #tpu.core_type<tc>} {
    %c0 = arith.constant 0 : index
    %c0_0 = arith.constant 0 : index
    %0 = vector.load %arg3[%c0, %c0_0] : memref<3x64xf32, #tpu.memory_space<vmem>>, vector<3x64xf32>
    %c0_1 = arith.constant 0 : index
    %c0_2 = arith.constant 0 : index
    %1 = vector.load %arg4[%c0_1, %c0_2] : memref<3x32xf32, #tpu.memory_space<vmem>>, vector<3x32xf32>
    %c0_3 = arith.constant 0 : index
    %c0_4 = arith.constant 0 : index
    %2 = vector.load %arg5[%c0_3, %c0_4] : memref<2x32xf32, #tpu.memory_space<vmem>>, vector<2x32xf32>
    %3 = vector.extract_strided_slice %0 {offsets = [0, 0], sizes = [1, 64], strides = [1, 1]} : vector<3x64xf32> to vector<1x64xf32>
    %4 = vector.extract_strided_slice %0 {offsets = [1, 0], sizes = [1, 64], strides = [1, 1]} : vector<3x64xf32> to vector<1x64xf32>
    %5 = vector.extract_strided_slice %0 {offsets = [2, 0], sizes = [1, 64], strides = [1, 1]} : vector<3x64xf32> to vector<1x64xf32>
    %6 = vector.extract_strided_slice %1 {offsets = [0, 0], sizes = [1, 32], strides = [1, 1]} : vector<3x32xf32> to vector<1x32xf32>
    %7 = vector.extract_strided_slice %1 {offsets = [1, 0], sizes = [1, 32], strides = [1, 1]} : vector<3x32xf32> to vector<1x32xf32>
    %8 = vector.extract_strided_slice %1 {offsets = [2, 0], sizes = [1, 32], strides = [1, 1]} : vector<3x32xf32> to vector<1x32xf32>
    %9 = vector.extract_strided_slice %2 {offsets = [0, 0], sizes = [1, 32], strides = [1, 1]} : vector<2x32xf32> to vector<1x32xf32>
    %c0_5 = arith.constant 0 : index
    %c0_6 = arith.constant 0 : index
    %10 = vector.load %arg2[%c0_5, %c0_6] : memref<32x64xf32, #tpu.memory_space<vmem>>, vector<32x64xf32>
    %c0_7 = arith.constant 0 : index
    %c0_8 = arith.constant 0 : index
    %11 = vector.load %arg0[%c0_7, %c0_8] : memref<128x16xbf16, #tpu.memory_space<vmem>>, vector<128x16xbf16>
    %c0_9 = arith.constant 0 : index
    %c0_10 = arith.constant 0 : index
    %12 = vector.load %arg1[%c0_9, %c0_10] : memref<16x64xbf16, #tpu.memory_space<vmem>>, vector<16x64xbf16>
    %cst = arith.constant dense<0.000000e+00> : vector<128x64xf32>
    %13 = tpu.matmul %11, %12, %cst {dimension_numbers = #tpu.dot_dimension_numbers<[1], [0], [0], [1], [0, 0, 1, 1], [], []>} : vector<128x16xbf16>, vector<16x64xbf16>, vector<128x64xf32> -> vector<128x64xf32>
    %14 = vector.broadcast %3 : vector<1x64xf32> to vector<128x64xf32>
    %15 = arith.addf %13, %14 : vector<128x64xf32>
    %cst_11 = arith.constant 0.000000e+00 : f32
    %16 = vector.broadcast %cst_11 : f32 to vector<128x64xf32>
    %17 = arith.maximumf %15, %16 : vector<128x64xf32>
    %cst_12 = arith.constant 0.000000e+00 : f32
    %18 = vector.broadcast %cst_12 : f32 to vector<1x64xf32>
    %19 = arith.maximumf %3, %18 : vector<1x64xf32>
    %cst_13 = arith.constant dense<0.000000e+00> : vector<64xf32>
    %20 = vector.multi_reduction <add>, %17, %cst_13 [0] : vector<128x64xf32> to vector<64xf32>
    %21 = vector.shape_cast %20 : vector<64xf32> to vector<1x64xf32>
    %22 = arith.mulf %17, %17 : vector<128x64xf32>
    %cst_14 = arith.constant dense<0.000000e+00> : vector<64xf32>
    %23 = vector.multi_reduction <add>, %22, %cst_14 [0] : vector<128x64xf32> to vector<64xf32>
    %24 = vector.shape_cast %23 : vector<64xf32> to vector<1x64xf32>
    %cst_15 = arith.constant 9.100000e+01 : f32
    %25 = vector.broadcast %cst_15 : f32 to vector<1x64xf32>
    %26 = arith.mulf %25, %19 : vector<1x64xf32>
    %27 = arith.subf %21, %26 : vector<1x64xf32>
    %28 = arith.mulf %19, %19 : vector<1x64xf32>
    %cst_16 = arith.constant 9.100000e+01 : f32
    %29 = vector.broadcast %cst_16 : f32 to vector<1x64xf32>
    %30 = arith.mulf %29, %28 : vector<1x64xf32>
    %31 = arith.subf %24, %30 : vector<1x64xf32>
    %cst_17 = arith.constant 0.0270270277 : f32
    %32 = vector.broadcast %cst_17 : f32 to vector<1x64xf32>
    %33 = arith.mulf %27, %32 : vector<1x64xf32>
    %cst_18 = arith.constant 0.0270270277 : f32
    %34 = vector.broadcast %cst_18 : f32 to vector<1x64xf32>
    %35 = arith.mulf %31, %34 : vector<1x64xf32>
    %36 = arith.mulf %33, %33 : vector<1x64xf32>
    %37 = arith.subf %35, %36 : vector<1x64xf32>
    %cst_19 = arith.constant 0.000000e+00 : f32
    %38 = vector.broadcast %cst_19 : f32 to vector<1x64xf32>
    %39 = arith.maximumf %37, %38 : vector<1x64xf32>
    %cst_20 = arith.constant 9.99999974E-6 : f32
    %40 = vector.broadcast %cst_20 : f32 to vector<1x64xf32>
    %41 = arith.addf %39, %40 : vector<1x64xf32>
    %42 = math.rsqrt %41 : vector<1x64xf32>
    %43 = arith.mulf %42, %4 : vector<1x64xf32>
    %44 = arith.mulf %33, %43 : vector<1x64xf32>
    %45 = arith.subf %5, %44 : vector<1x64xf32>
    %46 = vector.broadcast %43 : vector<1x64xf32> to vector<32x64xf32>
    %47 = arith.mulf %10, %46 : vector<32x64xf32>
    %48 = arith.truncf %47 : vector<32x64xf32> to vector<32x64xbf16>
    %49 = vector.shape_cast %45 : vector<1x64xf32> to vector<1x64xf32>
    %50 = vector.broadcast %49 : vector<1x64xf32> to vector<8x64xf32>
    %cst_21 = arith.constant dense<0.000000e+00> : vector<8x32xf32>
    %51 = tpu.matmul %50, %10, %cst_21 {dimension_numbers = #tpu.dot_dimension_numbers<[1], [1], [0], [0], [0, 0, 1, 0], [], []>} : vector<8x64xf32>, vector<32x64xf32>, vector<8x32xf32> -> vector<8x32xf32>
    %52 = vector.extract_strided_slice %51 {offsets = [0, 0], sizes = [1, 32], strides = [1, 1]} : vector<8x32xf32> to vector<1x32xf32>
    %53 = arith.addf %52, %6 : vector<1x32xf32>
    %54 = arith.truncf %17 : vector<128x64xf32> to vector<128x64xbf16>
    %cst_22 = arith.constant dense<0.000000e+00> : vector<128x32xf32>
    %55 = tpu.matmul %54, %48, %cst_22 {dimension_numbers = #tpu.dot_dimension_numbers<[1], [1], [0], [0], [0, 0, 1, 0], [], []>} : vector<128x64xbf16>, vector<32x64xbf16>, vector<128x32xf32> -> vector<128x32xf32>
    %56 = vector.broadcast %53 : vector<1x32xf32> to vector<128x32xf32>
    %57 = arith.addf %55, %56 : vector<128x32xf32>
    %cst_23 = arith.constant 0.000000e+00 : f32
    %58 = vector.broadcast %cst_23 : f32 to vector<128x32xf32>
    %59 = arith.maximumf %57, %58 : vector<128x32xf32>
    %60 = arith.mulf %19, %43 : vector<1x64xf32>
    %61 = arith.addf %60, %45 : vector<1x64xf32>
    %62 = vector.shape_cast %61 : vector<1x64xf32> to vector<1x64xf32>
    %63 = vector.broadcast %62 : vector<1x64xf32> to vector<8x64xf32>
    %cst_24 = arith.constant dense<0.000000e+00> : vector<8x32xf32>
    %64 = tpu.matmul %63, %10, %cst_24 {dimension_numbers = #tpu.dot_dimension_numbers<[1], [1], [0], [0], [0, 0, 1, 0], [], []>} : vector<8x64xf32>, vector<32x64xf32>, vector<8x32xf32> -> vector<8x32xf32>
    %65 = vector.extract_strided_slice %64 {offsets = [0, 0], sizes = [1, 32], strides = [1, 1]} : vector<8x32xf32> to vector<1x32xf32>
    %66 = arith.addf %65, %6 : vector<1x32xf32>
    %cst_25 = arith.constant 0.000000e+00 : f32
    %67 = vector.broadcast %cst_25 : f32 to vector<1x32xf32>
    %68 = arith.maximumf %66, %67 : vector<1x32xf32>
    %cst_26 = arith.constant dense<0.000000e+00> : vector<32xf32>
    %69 = vector.multi_reduction <add>, %59, %cst_26 [0] : vector<128x32xf32> to vector<32xf32>
    %70 = vector.shape_cast %69 : vector<32xf32> to vector<1x32xf32>
    %71 = arith.mulf %59, %59 : vector<128x32xf32>
    %cst_27 = arith.constant dense<0.000000e+00> : vector<32xf32>
    %72 = vector.multi_reduction <add>, %71, %cst_27 [0] : vector<128x32xf32> to vector<32xf32>
    %73 = vector.shape_cast %72 : vector<32xf32> to vector<1x32xf32>
    %cst_28 = arith.constant 9.100000e+01 : f32
    %74 = vector.broadcast %cst_28 : f32 to vector<1x32xf32>
    %75 = arith.mulf %74, %68 : vector<1x32xf32>
    %76 = arith.subf %70, %75 : vector<1x32xf32>
    %77 = arith.mulf %68, %68 : vector<1x32xf32>
    %cst_29 = arith.constant 9.100000e+01 : f32
    %78 = vector.broadcast %cst_29 : f32 to vector<1x32xf32>
    %79 = arith.mulf %78, %77 : vector<1x32xf32>
    %80 = arith.subf %73, %79 : vector<1x32xf32>
    %cst_30 = arith.constant 0.0270270277 : f32
    %81 = vector.broadcast %cst_30 : f32 to vector<1x32xf32>
    %82 = arith.mulf %76, %81 : vector<1x32xf32>
    %cst_31 = arith.constant 0.0270270277 : f32
    %83 = vector.broadcast %cst_31 : f32 to vector<1x32xf32>
    %84 = arith.mulf %80, %83 : vector<1x32xf32>
    %85 = arith.mulf %82, %82 : vector<1x32xf32>
    %86 = arith.subf %84, %85 : vector<1x32xf32>
    %cst_32 = arith.constant 0.000000e+00 : f32
    %87 = vector.broadcast %cst_32 : f32 to vector<1x32xf32>
    %88 = arith.maximumf %86, %87 : vector<1x32xf32>
    %cst_33 = arith.constant 9.99999974E-6 : f32
    %89 = vector.broadcast %cst_33 : f32 to vector<1x32xf32>
    %90 = arith.addf %88, %89 : vector<1x32xf32>
    %91 = math.rsqrt %90 : vector<1x32xf32>
    %92 = arith.mulf %91, %7 : vector<1x32xf32>
    %93 = arith.mulf %82, %92 : vector<1x32xf32>
    %94 = arith.subf %8, %93 : vector<1x32xf32>
    %95 = arith.mulf %9, %92 : vector<1x32xf32>
    %96 = arith.mulf %94, %9 : vector<1x32xf32>
    %cst_34 = arith.constant dense<0.000000e+00> : vector<1xf32>
    %97 = vector.multi_reduction <add>, %96, %cst_34 [1] : vector<1x32xf32> to vector<1xf32>
    %98 = vector.shape_cast %97 : vector<1xf32> to vector<1x1xf32>
    %99 = vector.extract_strided_slice %2 {offsets = [1, 0], sizes = [1, 1], strides = [1, 1]} : vector<2x32xf32> to vector<1x1xf32>
    %100 = arith.addf %98, %99 : vector<1x1xf32>
    %101 = vector.shape_cast %95 : vector<1x32xf32> to vector<1x32xf32>
    %102 = vector.broadcast %101 : vector<1x32xf32> to vector<8x32xf32>
    %103 = arith.truncf %102 : vector<8x32xf32> to vector<8x32xbf16>
    %104 = arith.truncf %59 : vector<128x32xf32> to vector<128x32xbf16>
    %cst_35 = arith.constant dense<0.000000e+00> : vector<8x128xf32>
    %105 = tpu.matmul %103, %104, %cst_35 {dimension_numbers = #tpu.dot_dimension_numbers<[1], [1], [0], [0], [0, 0, 1, 0], [], []>} : vector<8x32xbf16>, vector<128x32xbf16>, vector<8x128xf32> -> vector<8x128xf32>
    %106 = vector.extract_strided_slice %105 {offsets = [0, 0], sizes = [1, 128], strides = [1, 1]} : vector<8x128xf32> to vector<1x128xf32>
    %107 = vector.broadcast %100 : vector<1x1xf32> to vector<1x128xf32>
    %108 = arith.addf %106, %107 : vector<1x128xf32>
    %c0_36 = arith.constant 0 : index
    %c0_37 = arith.constant 0 : index
    %109 = vector.load %arg6[%c0_36, %c0_37] : memref<1x128xf32, #tpu.memory_space<vmem>>, vector<1x128xf32>
    tpu.vector_store %arg6[%c0_36, %c0_37], %108 {strides = array<i32>} : memref<1x128xf32, #tpu.memory_space<vmem>>, vector<1x128xf32>,
    return
  }
}

</mosaic_0001>

<bundles_post_ra>
// kernel: tpu_custom_call.1
= control target key start
LH: loop header
LB: loop body
LE: loop exit
PB: predicated region body
PF: predicated region fallthrough
CT: control target
= control target key end

     0   :  { %s1243_s0 = inlined_call_operand.vmem [shape: bf16[128,16], index: 0, kind: input, shape index: {}]   ;;  %s1244_s1 = inlined_call_operand.vmem [shape: bf16[16,64], index: 1, kind: input, shape index: {}]   ;;  %s1245_s2 = inlined_call_operand.vmem [shape: f32[32,64], index: 2, kind: input, shape index: {}]   ;;  %s1246_s3 = inlined_call_operand.vmem [shape: f32[3,64], index: 3, kind: input, shape index: {}]   ;;  %s1247_s4 = inlined_call_operand.vmem [shape: f32[3,32], index: 4, kind: input, shape index: {}]   ;;  %s1248_s5 = inlined_call_operand.vmem [shape: f32[2,32], index: 5, kind: input, shape index: {}]   ;;  %s1249_s6 = inlined_call_operand.hbm [shape: f32[1,128], index: 6, kind: output, shape index: {}]  }
   0x1   :  { %v766_v0 = vld [vmem:[%s1244_s1] sm:$0xff] }
   0x2   :  { %v758_v1 = vld [vmem:[%s1243_s0] sm:$0xff] }
   0x3   :  { %11 = vsyncpa [#allocation3], 0  ;;  %129 = vmatpush.bf16.msra.mxu0 %v766_v0  ;;  %vm97_vm0 = vcmask 130048   ;;  %767 = vmatpush.bf16.msra.mxu3 %v766_v0  ;;  %v759_v2 = vld [vmem:[%s1243_s0 + $0x8] sm:$0xff]  ;;  %v764_v3 = vld [vmem:[%s1243_s0 + $0x30] sm:$0xff]  ;;  %vm188_vm1 = vcmask 523264  }
   0x4   :  { %v760_v4 = vld [vmem:[%s1243_s0 + $0x10] sm:$0xff]  ;;  %v765_v5 = vld [vmem:[%s1243_s0 + $0x38] sm:$0xff]  ;;  %v762_v7 = vld [vmem:[%s1243_s0 + $0x20] sm:$0xff]  ;;  %vm488_vm5 = vcmask 261120   ;;  %vm614_vm9 = vcmask 256002   ;;  %s686_s27 = sshll.u32 %s1249_s6, 4  ;;  %s687_s27 = int_to_ptr.hbm [resolvable:$true] %s686_s27 }
   0x5   :  { %v761_v6 = vld [vmem:[%s1243_s0 + $0x18] sm:$0xff]  ;;  %v763_v8 = vld [vmem:[%s1243_s0 + $0x28] sm:$0xff]  ;;  %v878_v9 = vld [vmem:[%s1246_s3] sm:$0x7] }
   0x6   :  { %731 = vmatmul.msk.bf16.vlgmr.msra.gmra.mxu0 %vm97_vm0, %v758_v1  ;;  %737 = vmatmul.msk.bf16.vlgmr.msra.gmra.mxu3 %vm97_vm0, %v764_v3  ;;  %v881_v11 = vperm.slane %v878_v9, 0 }
  0x16   :  { %732 = vmatmul.msk.bf16.gmra.mxu0 %vm97_vm0, %v759_v2  ;;  %738 = vmatmul.msk.bf16.gmra.mxu3 %vm97_vm0, %v765_v5 }
  0x26   :  { %733 = vmatmul.msk.bf16.gmra.mxu0 %vm97_vm0, %v760_v4 }
  0x36   :  { %734 = vmatmul.msk.bf16.gmra.mxu0 %vm97_vm0, %v761_v6 }
  0x46   :  { %735 = vmatmul.msk.bf16.gmra.mxu0 %vm97_vm0, %v762_v7 }
  0x56   :  { %736 = vmatmul.msk.bf16.gmra.mxu0 %vm97_vm0, %v763_v8 }
  0x83   :  { %v131_v10 = vpop.f32.mrf.mxu0 }
  0x84   :  { %v132_v12 = vadd.f32 %v131_v10, %v881_v11 }
  0x86   :  { %v885_v15 = vmax.f32 %v132_v12, 0.0 }
  0x88   :  { %v226_v55 = vmul.f32 %v885_v15, %v885_v15  ;;  %v189_v59 = vsel %vm188_vm1, %v885_v15, 0.0 }
  0x89   :  { %v161_v26 = vpop.f32.mrf.mxu3 }
  0x8a   :  { %v162_v29 = vadd.f32 %v161_v26, %v881_v11  ;;  %v242_v1 = vsel %vm188_vm1, %v226_v55, 0.0 }
  0x8b   :  { %v133_v13 = vpop.f32.mrf.mxu0 }
  0x8c   :  { %v134_v14 = vadd.f32 %v133_v13, %v881_v11  ;;  %v903_v33 = vmax.f32 %v162_v29, 0.0 }
  0x8e   :  { %v887_v16 = vmax.f32 %v134_v14, 0.0 }
  0x90   :  { %v353_v17 = vpack.c.bf16 %v887_v16, %v885_v15  ;;  %v227_v54 = vmul.f32 %v887_v16, %v887_v16  ;;  %v190_v57 = vsel %vm188_vm1, %v887_v16, 0.0 }
  0x91   :  { %v163_v30 = vpop.f32.mrf.mxu3  ;;  %v191_v2 = vadd.f32 %v190_v57, %v189_v59 }
  0x92   :  { %v164_v32 = vadd.f32 %v163_v30, %v881_v11  ;;  %v243_v61 = vsel %vm188_vm1, %v227_v54, 0.0 }
  0x93   :  { %v136_v18 = vpop.f32.mrf.mxu0  ;;  %v244_v8 = vadd.f32 %v243_v61, %v242_v1 }
  0x94   :  { %v137_v19 = vadd.f32 %v136_v18, %v881_v11  ;;  %v907_v35 = vmax.f32 %v164_v32, 0.0 }
  0x96   :  { %v893_v22 = vmax.f32 %v137_v19, 0.0  ;;  %v359_v37 = vpack.c.bf16 %v907_v35, %v903_v33 }
  0x98   :  { %v228_v56 = vmul.f32 %v893_v22, %v893_v22  ;;  %v192_v62 = vsel %vm188_vm1, %v893_v22, 0.0 }
  0x99   :  { %v166_v40 = vpop.f32.mrf.mxu3  ;;  %v193_v10 = vadd.f32 %v192_v62, %v191_v2 }
  0x9a   :  { %v167_v43 = vadd.f32 %v166_v40, %v881_v11  ;;  %v245_v3 = vsel %vm188_vm1, %v228_v56, 0.0 }
  0x9b   :  { %v138_v20 = vpop.f32.mrf.mxu0  ;;  %v246_v19 = vadd.f32 %v245_v3, %v244_v8 }
  0x9c   :  { %v139_v21 = vadd.f32 %v138_v20, %v881_v11  ;;  %v919_v47 = vmax.f32 %v167_v43, 0.0 }
  0x9e   :  { %v895_v23 = vmax.f32 %v139_v21, 0.0 }
  0xa0   :  { %v354_v24 = vpack.c.bf16 %v895_v23, %v893_v22  ;;  %v229_v63 = vmul.f32 %v895_v23, %v895_v23  ;;  %v194_v4 = vsel %vm188_vm1, %v895_v23, 0.0 }
  0xa1   :  { %v168_v44 = vpop.f32.mrf.mxu3  ;;  %v195_v20 = vadd.f32 %v194_v4, %v193_v10 }
  0xa2   :  { %v169_v46 = vadd.f32 %v168_v44, %v881_v11  ;;  %v247_v12 = vsel %vm188_vm1, %v229_v63, 0.0 }
  0xa3   :  { %v141_v25 = vpop.f32.mrf.mxu0 }
  0xa4   :  { %v142_v27 = vadd.f32 %v141_v25, %v881_v11  ;;  %v923_v49 = vmax.f32 %v169_v46, 0.0 }
  0xa6   :  { %v909_v36 = vmax.f32 %v142_v27, 0.0  ;;  %v360_v51 = vpack.c.bf16 %v923_v49, %v919_v47  ;;  %v248_v27 = vadd.f32 %v247_v12, %v246_v19 }
  0xa8   :  { %v230_v5 = vmul.f32 %v909_v36, %v909_v36  ;;  %v196_v13 = vsel %vm188_vm1, %v909_v36, 0.0 }
  0xaa   :  { %v249_v21 = vsel %vm188_vm1, %v230_v5, 0.0 }
  0xab   :  { %v143_v28 = vpop.f32.mrf.mxu0  ;;  %v250_v40 = vadd.f32 %v249_v21, %v248_v27  ;;  %v239_v27 = vmul.f32 %v907_v35, %v907_v35 }
  0xac   :  { %v144_v31 = vadd.f32 %v143_v28, %v881_v11  ;;  %v197_v28 = vadd.f32 %v196_v13, %v195_v20 }
  0xae   :  { %v905_v34 = vmax.f32 %v144_v31, 0.0 }
  0xb0   :  { %v355_v38 = vpack.c.bf16 %v905_v34, %v909_v36  ;;  %v231_v14 = vmul.f32 %v905_v34, %v905_v34  ;;  %v198_v25 = vsel %vm188_vm1, %v905_v34, 0.0 }
  0xb2   :  { %v251_v30 = vsel %vm188_vm1, %v231_v14, 0.0  ;;  %v238_v14 = vmul.f32 %v903_v33, %v903_v33 }
  0xb3   :  { %v146_v39 = vpop.f32.mrf.mxu0  ;;  %v252_v46 = vadd.f32 %v251_v30, %v250_v40 }
  0xb4   :  { %v147_v41 = vadd.f32 %v146_v39, %v881_v11 }
  0xb6   :  { %v925_v50 = vmax.f32 %v147_v41, 0.0  ;;  %v199_v41 = vadd.f32 %v198_v25, %v197_v28 }
  0xb8   :  { %v232_v26 = vmul.f32 %v925_v50, %v925_v50  ;;  %v200_v31 = vsel %vm188_vm1, %v925_v50, 0.0 }
  0xbb   :  { %v148_v42 = vpop.f32.mrf.mxu0 }
  0xbc   :  { %v149_v45 = vadd.f32 %v148_v42, %v881_v11  ;;  %v253_v42 = vsel %vm188_vm1, %v232_v26, 0.0  ;;  %v212_v26 = vsel %vm188_vm1, %v903_v33, 0.0 }
  0xbd   :  { %v254_v57 = vadd.f32 %v253_v42, %v252_v46  ;;  %v267_v42 = vsel %vm188_vm1, %v239_v27, 0.0  ;;  %v29_v27 = vld [vmem:[%s1245_s2 + $0x8] sm:$0xff] }
  0xbe   :  { %v921_v48 = vmax.f32 %v149_v45, 0.0 }
  0xc0   :  { %v356_v52 = vpack.c.bf16 %v921_v48, %v925_v50  ;;  %v233_v32 = vmul.f32 %v921_v48, %v921_v48  ;;  %v202_v43 = vsel %vm188_vm1, %v921_v48, 0.0 }
  0xc2   :  { %v255_v54 = vsel %vm188_vm1, %v233_v32, 0.0  ;;  %v214_v32 = vsel %vm188_vm1, %v907_v35, 0.0  ;;  %v1094_v35 = vld [vmem:[%s1247_s4] sm:$0x7] }
  0xc3   :  { %v151_v53 = vpop.f32.mrf.mxu0  ;;  %v256_v62 = vadd.f32 %v255_v54, %v254_v57 }
  0xc4   :  { %v152_v58 = vadd.f32 %v151_v53, %v881_v11  ;;  %v201_v53 = vadd.f32 %v200_v31, %v199_v41  ;;  %v265_v31 = vsel %vm188_vm1, %v238_v14, 0.0  ;;  %v30_v14 = vld [vmem:[%s1245_s2 + $0x10] sm:$0xff] }
  0xc6   :  { %v954_v6 = vmax.f32 %v152_v58, 0.0  ;;  %v203_v58 = vadd.f32 %v202_v43, %v201_v53  ;;  %v216_v43 = vsel %vm188_vm1, %v919_v47, 0.0 }
  0xc8   :  { %v234_v44 = vmul.f32 %v954_v6, %v954_v6  ;;  %v204_v55 = vsel %vm188_vm1, %v954_v6, 0.0 }
  0xc9   :  { %v205_v63 = vadd.f32 %v204_v55, %v203_v58  ;;  %v218_v55 = vsel %vm188_vm1, %v923_v49, 0.0 }
  0xca   :  { %v257_v59 = vsel %vm188_vm1, %v234_v44, 0.0  ;;  %v241_v44 = vmul.f32 %v923_v49, %v923_v49 }
  0xcb   :  { %v153_v60 = vpop.f32.mrf.mxu0  ;;  %v258_v4 = vadd.f32 %v257_v59, %v256_v62  ;;  %v1030_v59 = vld [vmem:[%s1245_s2 + $0x18] sm:$0xff]  ;;  %v187_v62 = vmax.f32 %v878_v9, 0.0 }
  0xcc   :  { %v154_v0 = vadd.f32 %v153_v60, %v881_v11  ;;  %v271_v58 = vsel %vm188_vm1, %v241_v44, 0.0  ;;  %739 = vmatpush.xpose.msk.msra.mxu1 %vm188_vm1, %v1030_v59 }
  0xce   :  { %v956_v7 = vmax.f32 %v154_v0, 0.0 }
  0xd0   :  { %v357_v18 = vpack.c.bf16 %v956_v7, %v954_v6  ;;  %v235_v56 = vmul.f32 %v956_v7, %v956_v7  ;;  %v206_v60 = vsel %vm188_vm1, %v956_v7, 0.0  ;;  %740 = vmatpush.xpose.msk.msra.mxu1 %vm188_vm1, %v30_v14 }
  0xd1   :  { %v207_v5 = vadd.f32 %v206_v60, %v205_v63 }
  0xd2   :  { %v259_v1 = vsel %vm188_vm1, %v235_v56, 0.0 }
  0xd3   :  { %v156_v29 = vpop.f32.mrf.mxu0  ;;  %v260_v12 = vadd.f32 %v259_v1, %v258_v4 }
  0xd4   :  { %v157_v39 = vadd.f32 %v156_v29, %v881_v11  ;;  %741 = vmatpush.xpose.msk.msra.mxu1 %vm188_vm1, %v29_v27 }
  0xd6   :  { %v981_v45 = vmax.f32 %v157_v39, 0.0  ;;  %v240_v39 = vmul.f32 %v919_v47, %v919_v47 }
  0xd8   :  { %v236_v61 = vmul.f32 %v981_v45, %v981_v45  ;;  %v208_v2 = vsel %vm188_vm1, %v981_v45, 0.0  ;;  %v269_v54 = vsel %vm188_vm1, %v240_v39, 0.0 }
  0xd9   :  { %v209_v13 = vadd.f32 %v208_v2, %v207_v5  ;;  %v281_v5 = vmul.f32 %v187_v62, %v187_v62 }
  0xda   :  { %v261_v8 = vsel %vm188_vm1, %v236_v61, 0.0 }
  0xdb   :  { %v158_v0 = vpop.f32.mrf.mxu0  ;;  %v262_v21 = vadd.f32 %v261_v8, %v260_v12 }
  0xdc   :  { %v159_v3 = vadd.f32 %v158_v0, %v881_v11 }
  0xde   :  { %v998_v10 = vmax.f32 %v159_v3, 0.0 }
  0xe0   :  { %v210_v19 = vsel %vm188_vm1, %v998_v10, 0.0  ;;  %v237_v20 = vmul.f32 %v998_v10, %v998_v10  ;;  %v358_v11 = vpack.c.bf16 %v998_v10, %v981_v45 }
  0xe1   :  { %v211_v25 = vadd.f32 %v210_v19, %v209_v13  ;;  %v279_v13 = vmul.f32 91.0, %v187_v62 }
  0xe2   :  { %v263_v28 = vsel %vm188_vm1, %v237_v20, 0.0 }
  0xe3   :  { %v213_v29 = vadd.f32 %v212_v26, %v211_v25  ;;  %v264_v30 = vadd.f32 %v263_v28, %v262_v21  ;;  %v282_v21 = vmul.f32 91.0, %v281_v5 }
  0xe5   :  { %v266_v40 = vadd.f32 %v265_v31, %v264_v30  ;;  %v215_v41 = vadd.f32 %v214_v32, %v213_v29  ;;  %v28_v32 = vld [vmem:[%s1245_s2] sm:$0xff] }
  0xe6   :  { %742 = vmatpush.xpose.msk.msra.mxu1 %vm188_vm1, %v28_v32 }
  0xe7   :  { %v217_v46 = vadd.f32 %v216_v43, %v215_v41  ;;  %v268_v53 = vadd.f32 %v267_v42, %v266_v40 }
  0xe9   :  { %v219_v56 = vadd.f32 %v218_v55, %v217_v46  ;;  %v270_v57 = vadd.f32 %v269_v54, %v268_v53  ;;  %v301_v54 = vrot.slane %v878_v9, 1 }
  0xeb   :  { %v220_v60 = vrot.slane %v219_v56, 4  ;;  %v272_v61 = vadd.f32 %v271_v58, %v270_v57 }
  0xed   :  { %v221_v63 = vadd.f32 %v220_v60, %v219_v56  ;;  %v273_v0 = vrot.slane %v272_v61, 4 }
  0xef   :  { %v222_v1 = vrot.slane %v221_v63, 2  ;;  %v274_v2 = vadd.f32 %v273_v0, %v272_v61 }
  0xf1   :  { %v223_v3 = vadd.f32 %v222_v1, %v221_v63  ;;  %v275_v4 = vrot.slane %v274_v2, 2 }
  0xf3   :  { %v224_v8 = vrot.slane %v223_v3, 1  ;;  %v276_v12 = vadd.f32 %v275_v4, %v274_v2 }
  0xf5   :  { %v225_v19 = vadd.f32 %v224_v8, %v223_v3  ;;  %v277_v20 = vrot.slane %v276_v12, 1 }
  0xf7   :  { %v278_v25 = vadd.f32 %v277_v20, %v276_v12  ;;  %v280_v26 = vsub.f32 %v225_v19, %v279_v13 }
  0xf9   :  { %v283_v28 = vsub.f32 %v278_v25, %v282_v21  ;;  %v284_v29 = vmul.f32 0.027027028, %v280_v26 }
  0xfb   :  { %v285_v30 = vmul.f32 0.027027028, %v283_v28  ;;  %v286_v31 = vmul.f32 %v284_v29, %v284_v29 }
  0xfd   :  { %v287_v39 = vsub.f32 %v285_v30, %v286_v31 }
  0xff   :  { %v288_v40 = vmax.f32 %v287_v39, 0.0 }
 0x101   :  { %v289_v41 = vadd.f32 1e-05, %v288_v40 }
 0x103   :  { %773 = vrsqrt.f32 %v289_v41  ;;  %vm296_vm3 = vweird.f32 %v289_v41 }
 0x109   :  { %v774_v42 = vpop.eup %773 }
 0x10a   :  { %v291_v43 = vmul.f32 %v774_v42, %v289_v41  ;;  %vm297_vm2 = vweird.f32 %v774_v42 }
 0x10b   :  { %vm298_vm4 = vmor %vm296_vm3, %vm297_vm2 }
 0x10c   :  { %v292_v44 = vmul.f32 %v774_v42, %v291_v43 }
 0x10e   :  { %v293_v46 = vmul.f32 0.5, %v292_v44 }
 0x110   :  { %v294_v53 = vsub.f32 1.5, %v293_v46 }
 0x112   :  { %v295_v55 = vmul.f32 %v774_v42, %v294_v53 }
 0x114   :  { %v299_v56 = vsel %vm298_vm4, %v774_v42, %v295_v55 }
 0x115   :  { %v303_v57 = vmul.f32 %v301_v54, %v299_v56 }
 0x117   :  { %v309_v58 = vperm.slane %v303_v57, 0  ;;  %v304_v60 = vmul.f32 %v303_v57, %v284_v29  ;;  %v457_v12 = vmul.f32 %v303_v57, %v187_v62 }
 0x119   :  { %v313_v61 = vmul.f32 %v309_v58, %v1030_v59  ;;  %v312_v63 = vmul.f32 %v309_v58, %v30_v14  ;;  %v306_v0 = vrot.slane %v304_v60, 6  ;;  %v311_v3 = vmul.f32 %v309_v58, %v29_v27 }
 0x11a   :  { %v310_v4 = vmul.f32 %v309_v58, %v28_v32 }
 0x11b   :  { %v315_v1 = vpack.c.bf16 %v313_v61, %v312_v63  ;;  %v308_v2 = vsub.f32 %v878_v9, %v306_v0 }
 0x11c   :  { %v314_v20 = vpack.c.bf16 %v311_v3, %v310_v4 }
 0x11d   :  { %v390_v5 = vsel %vm188_vm1, %v315_v1, 0  ;;  %v316_v8 = vperm.slane %v308_v2, 2  ;;  %v459_v13 = vrot.slane %v308_v2, 2 }
 0x11e   :  { %398 = vmatpush.bf16.xpose.msra.mxu2 %v390_v5  ;;  %768 = vmatpush.bf16.xpose.msrb.mxu3 %v390_v5  ;;  %v387_v21 = vsel %vm188_vm1, %v314_v20, 0 }
 0x11f   :  { %743 = vmatmul.msk.f32.vlgmr.msra.gmra.mxu1 %vm188_vm1, %v316_v8  ;;  %v461_v19 = vadd.f32 %v459_v13, %v457_v12 }
 0x121   :  { %v462_v9 = vperm.slane %v461_v19, 0 }
 0x126   :  { %399 = vmatpush.bf16.xpose.msra.mxu2 %v387_v21  ;;  %769 = vmatpush.bf16.xpose.msrb.mxu3 %v387_v21 }
 0x12d   :  { %744 = vmatmul.msk.bf16.vlgmr.msra.gmra.mxu2 %vm188_vm1, %v353_v17  ;;  %749 = vmatmul.msk.bf16.vlgmr.msrb.gmra.mxu3 %vm188_vm1, %v358_v11 }
 0x12e   :  { %752 = vmatpush.xpose.msk.msra.mxu3 %vm188_vm1, %v1030_v59 }
 0x132   :  { %753 = vmatpush.xpose.msk.msra.mxu3 %vm188_vm1, %v30_v14 }
 0x136   :  { %754 = vmatpush.xpose.msk.msra.mxu3 %vm188_vm1, %v29_v27 }
 0x13a   :  { %755 = vmatpush.xpose.msk.msra.mxu3 %vm188_vm1, %v28_v32 }
 0x13d   :  { %745 = vmatmul.msk.bf16.gmra.mxu2 %vm188_vm1, %v354_v24  ;;  %750 = vmatmul.msk.bf16.gmra.mxu3 %vm188_vm1, %v359_v37 }
 0x14d   :  { %746 = vmatmul.msk.bf16.gmra.mxu2 %vm188_vm1, %v355_v38  ;;  %751 = vmatmul.msk.bf16.gmra.mxu3 %vm188_vm1, %v360_v51 }
 0x15d   :  { %747 = vmatmul.msk.bf16.gmra.mxu2 %vm188_vm1, %v356_v52  ;;  %756 = vmatmul.msk.f32.vlgmr.msra.gmra.mxu3 %vm188_vm1, %v462_v9 }
 0x16d   :  { %748 = vmatmul.msk.bf16.gmra.mxu2 %vm188_vm1, %v357_v18 }
 0x19c   :  { %v349_v36 = vpop.f32.mrf.mxu1 }
 0x19d   :  { %v352_v47 = vadd.f32 %v349_v36, %v1094_v35 }
 0x19f   :  { %v1097_v48 = vperm.slane %v352_v47, 0 }
 0x1b0   :  { %v401_v15 = vpop.f32.mrf.mxu2  ;;  %v426_v16 = vpop.f32.mrf.mxu3 }
 0x1b1   :  { %v402_v25 = vadd.f32 %v401_v15, %v1097_v48  ;;  %v427_v39 = vadd.f32 %v426_v16, %v1097_v48 }
 0x1b3   :  { %v1123_v32 = vmax.f32 %v402_v25, 0.0  ;;  %v451_v56 = vmax.f32 %v427_v39, 0.0 }
 0x1b5   :  { %v526_v55 = vmul.f32 %v1123_v32, %v1123_v32  ;;  %v489_v63 = vsel %vm488_vm5, %v1123_v32, 0.0 }
 0x1b7   :  { %v542_v8 = vsel %vm488_vm5, %v526_v55, 0.0 }
 0x1b8   :  { %v403_v17 = vpop.f32.mrf.mxu2  ;;  %v428_v22 = vpop.f32.mrf.mxu3 }
 0x1b9   :  { %v404_v14 = vadd.f32 %v403_v17, %v1097_v48  ;;  %v429_v28 = vadd.f32 %v428_v22, %v1097_v48 }
 0x1bb   :  { %v1121_v31 = vmax.f32 %v404_v14, 0.0  ;;  %v1129_v42 = vmax.f32 %v429_v28, 0.0 }
 0x1bd   :  { %v527_v53 = vmul.f32 %v1121_v31, %v1121_v31  ;;  %v490_v57 = vsel %vm488_vm5, %v1121_v31, 0.0  ;;  %v628_v1 = vpack.c.bf16 %v1129_v42, %v451_v56 }
 0x1be   :  { %v491_v12 = vadd.f32 %v490_v57, %v489_v63 }
 0x1bf   :  { %v543_v2 = vsel %vm488_vm5, %v527_v53, 0.0  ;;  %v650_v22 = vsel %vm488_vm5, %v628_v1, 0 }
 0x1c0   :  { %v406_v23 = vpop.f32.mrf.mxu2  ;;  %v431_v24 = vpop.f32.mrf.mxu3  ;;  %v544_v9 = vadd.f32 %v543_v2, %v542_v8  ;;  %v537_v8 = vmul.f32 %v1129_v42, %v1129_v42 }
 0x1c1   :  { %v432_v45 = vadd.f32 %v431_v24, %v1097_v48  ;;  %v407_v27 = vadd.f32 %v406_v23, %v1097_v48 }
 0x1c3   :  { %v1114_v26 = vmax.f32 %v432_v45, 0.0  ;;  %v1126_v40 = vmax.f32 %v407_v27, 0.0 }
 0x1c5   :  { %v528_v58 = vmul.f32 %v1126_v40, %v1126_v40  ;;  %v492_v3 = vsel %vm488_vm5, %v1126_v40, 0.0 }
 0x1c6   :  { %v493_v15 = vadd.f32 %v492_v3, %v491_v12 }
 0x1c7   :  { %v545_v13 = vsel %vm488_vm5, %v528_v58, 0.0 }
 0x1c8   :  { %v408_v33 = vpop.f32.mrf.mxu2  ;;  %v433_v34 = vpop.f32.mrf.mxu3  ;;  %v546_v36 = vadd.f32 %v545_v13, %v544_v9  ;;  %v510_v9 = vsel %vm488_vm5, %v1129_v42, 0.0 }
 0x1c9   :  { %v434_v7 = vadd.f32 %v433_v34, %v1097_v48  ;;  %v409_v29 = vadd.f32 %v408_v33, %v1097_v48 }
 0x1cb   :  { %v1109_v11 = vmax.f32 %v434_v7, 0.0  ;;  %v1131_v43 = vmax.f32 %v409_v29, 0.0 }
 0x1cd   :  { %v629_v30 = vpack.c.bf16 %v1109_v11, %v1114_v26  ;;  %v529_v0 = vmul.f32 %v1131_v43, %v1131_v43  ;;  %v494_v19 = vsel %vm488_vm5, %v1131_v43, 0.0 }
 0x1cf   :  { %v653_v46 = vsel %vm488_vm5, %v629_v30, 0  ;;  %v547_v16 = vsel %vm488_vm5, %v529_v0, 0.0 }
 0x1d0   :  { %v411_v37 = vpop.f32.mrf.mxu2  ;;  %v436_v38 = vpop.f32.mrf.mxu3 }
 0x1d1   :  { %v437_v49 = vadd.f32 %v436_v38, %v1097_v48  ;;  %v412_v41 = vadd.f32 %v411_v37, %v1097_v48  ;;  %v495_v37 = vadd.f32 %v494_v19, %v493_v15  ;;  %v538_v15 = vmul.f32 %v1114_v26, %v1114_v26 }
 0x1d3   :  { %v1104_v18 = vmax.f32 %v437_v49, 0.0  ;;  %v1143_v60 = vmax.f32 %v412_v41, 0.0  ;;  %v565_v42 = vsel %vm488_vm5, %v538_v15, 0.0 }
 0x1d5   :  { %v530_v20 = vmul.f32 %v1143_v60, %v1143_v60  ;;  %v496_v23 = vsel %vm488_vm5, %v1143_v60, 0.0 }
 0x1d7   :  { %v549_v38 = vsel %vm488_vm5, %v530_v20, 0.0 }
 0x1d8   :  { %v413_v50 = vpop.f32.mrf.mxu2  ;;  %v438_v51 = vpop.f32.mrf.mxu3 }
 0x1d9   :  { %v439_v52 = vadd.f32 %v438_v51, %v1097_v48  ;;  %v414_v54 = vadd.f32 %v413_v50, %v1097_v48  ;;  %v548_v51 = vadd.f32 %v547_v16, %v546_v36 }
 0x1db   :  { %v1101_v6 = vmax.f32 %v439_v52, 0.0  ;;  %v1154_v4 = vmax.f32 %v414_v54, 0.0  ;;  %v497_v52 = vadd.f32 %v496_v23, %v495_v37  ;;  %v539_v23 = vmul.f32 %v1109_v11, %v1109_v11 }
 0x1dc   :  { %v514_v37 = vsel %vm488_vm5, %v1109_v11, 0.0 }
 0x1dd   :  { %v630_v10 = vpack.c.bf16 %v1101_v6, %v1104_v18  ;;  %v531_v24 = vmul.f32 %v1154_v4, %v1154_v4  ;;  %v498_v47 = vsel %vm488_vm5, %v1154_v4, 0.0 }
 0x1df   :  { %v656_v62 = vsel %vm488_vm5, %v630_v10, 0  ;;  %v551_v7 = vsel %vm488_vm5, %v531_v24, 0.0 }
 0x1e0   :  { %v416_v59 = vpop.f32.mrf.mxu2  ;;  %658 = vmatpush.bf16.xpose.msrb.mxu1 %v656_v62  ;;  %v499_v62 = vadd.f32 %v498_v47, %v497_v52 }
 0x1e1   :  { %v417_v61 = vadd.f32 %v416_v59, %v1097_v48  ;;  %v550_v59 = vadd.f32 %v549_v38, %v548_v51  ;;  %v540_v38 = vmul.f32 %v1104_v18, %v1104_v18 }
 0x1e3   :  { %v1163_v21 = vmax.f32 %v417_v61, 0.0  ;;  %v552_v28 = vadd.f32 %v551_v7, %v550_v59  ;;  %v536_v61 = vmul.f32 %v451_v56, %v451_v56  ;;  %v569_v11 = vsel %vm488_vm5, %v540_v38, 0.0 }
 0x1e4   :  { %v518_v7 = vsel %vm488_vm5, %v1101_v6, 0.0 }
 0x1e5   :  { %v532_v49 = vmul.f32 %v1163_v21, %v1163_v21  ;;  %v500_v45 = vsel %vm488_vm5, %v1163_v21, 0.0  ;;  %v561_v20 = vsel %vm488_vm5, %v536_v61, 0.0 }
 0x1e6   :  { %v501_v29 = vadd.f32 %v500_v45, %v499_v62  ;;  %v483_v45 = vpop.f32.mrf.mxu3 }
 0x1e7   :  { %v553_v14 = vsel %vm488_vm5, %v532_v49, 0.0 }
 0x1e8   :  { %v418_v44 = vpop.f32.mrf.mxu2  ;;  %659 = vmatpush.bf16.xpose.msrb.mxu1 %v653_v46  ;;  %v554_v46 = vadd.f32 %v553_v14, %v552_v28  ;;  %v486_v14 = vadd.f32 %v483_v45, %v1094_v35 }
 0x1e9   :  { %v419_v5 = vadd.f32 %v418_v44, %v1097_v48 }
 0x1eb   :  { %v1171_v33 = vmax.f32 %v419_v5, 0.0  ;;  %v508_v5 = vsel %vm488_vm5, %v451_v56, 0.0 }
 0x1ed   :  { %v533_v10 = vmul.f32 %v1171_v33, %v1171_v33  ;;  %v502_v25 = vsel %vm488_vm5, %v1171_v33, 0.0  ;;  %v626_v24 = vpack.c.bf16 %v1171_v33, %v1163_v21  ;;  %v541_v21 = vmul.f32 %v1101_v6, %v1101_v6 }
 0x1ee   :  { %v503_v53 = vadd.f32 %v502_v25, %v501_v29 }
 0x1ef   :  { %v555_v39 = vsel %vm488_vm5, %v533_v10, 0.0  ;;  %v644_v33 = vsel %vm488_vm5, %v626_v24, 0  ;;  %v571_v62 = vsel %vm488_vm5, %v541_v21, 0.0 }
 0x1f0   :  { %v421_v17 = vpop.f32.mrf.mxu2  ;;  %660 = vmatpush.bf16.xpose.msrb.mxu1 %v650_v22  ;;  %v556_v57 = vadd.f32 %v555_v39, %v554_v46  ;;  %v512_v22 = vsel %vm488_vm5, %v1114_v26, 0.0  ;;  %v567_v26 = vsel %vm488_vm5, %v539_v23, 0.0  ;;  %v487_v39 = vmax.f32 %v486_v14, 0.0 }
 0x1f1   :  { %v422_v34 = vadd.f32 %v421_v17, %v1097_v48  ;;  %v563_v17 = vsel %vm488_vm5, %v537_v8, 0.0 }
 0x1f3   :  { %v449_v50 = vmax.f32 %v422_v34, 0.0 }
 0x1f5   :  { %v534_v27 = vmul.f32 %v449_v50, %v449_v50  ;;  %v504_v41 = vsel %vm488_vm5, %v449_v50, 0.0 }
 0x1f6   :  { %v505_v58 = vadd.f32 %v504_v41, %v503_v53  ;;  %v624_v53 = vpack.c.bf16 %v1131_v43, %v1126_v40 }
 0x1f7   :  { %v557_v54 = vsel %vm488_vm5, %v534_v27, 0.0 }
 0x1f8   :  { %v423_v30 = vpop.f32.mrf.mxu2  ;;  %v558_v2 = vadd.f32 %v557_v54, %v556_v57  ;;  %v581_v54 = vmul.f32 %v487_v39, %v487_v39  ;;  %v638_v61 = vsel %vm488_vm5, %v624_v53, 0 }
 0x1f9   :  { %v424_v44 = vadd.f32 %v423_v30, %v1097_v48 }
 0x1fb   :  { %v450_v55 = vmax.f32 %v424_v44, 0.0 }
 0x1fd   :  { %v506_v63 = vsel %vm488_vm5, %v450_v55, 0.0  ;;  %v535_v0 = vmul.f32 %v450_v55, %v450_v55  ;;  %v627_v1 = vpack.c.bf16 %v450_v55, %v449_v50  ;;  %v516_v50 = vsel %vm488_vm5, %v1104_v18, 0.0 }
 0x1fe   :  { %v507_v3 = vadd.f32 %v506_v63, %v505_v58  ;;  %v625_v18 = vpack.c.bf16 %v1154_v4, %v1143_v60  ;;  %v579_v4 = vmul.f32 91.0, %v487_v39  ;;  %v582_v63 = vmul.f32 91.0, %v581_v54 }
 0x1ff   :  { %v559_v48 = vsel %vm488_vm5, %v535_v0, 0.0  ;;  %v647_v12 = vsel %vm488_vm5, %v627_v1, 0 }
 0x200   :  { %v509_v13 = vadd.f32 %v508_v5, %v507_v3  ;;  %v560_v19 = vadd.f32 %v559_v48, %v558_v2  ;;  %661 = vmatpush.bf16.xpose.msrb.mxu1 %v647_v12  ;;  %v641_v30 = vsel %vm488_vm5, %v625_v18, 0  ;;  %v623_v5 = vpack.c.bf16 %v1121_v31, %v1123_v32  ;;  %v27_v31 = vld [vmem:[%s1248_s5] sm:$0x3]  ;;  %s804_s5 = smov [#allocation2]  }
 0x201   :  { %s684_s24 = sshll.u32 %s804_s5, 4  ;;  %s685_s24 = int_to_ptr.vmem [resolvable:$true] %s684_s24 }
 0x202   :  { %v511_v16 = vadd.f32 %v510_v9, %v509_v13  ;;  %v562_v56 = vadd.f32 %v561_v20, %v560_v19  ;;  %v635_v43 = vsel %vm488_vm5, %v623_v5, 0 }
 0x204   :  { %v513_v34 = vadd.f32 %v512_v22, %v511_v16  ;;  %v564_v36 = vadd.f32 %v563_v17, %v562_v56  ;;  %v601_v56 = vrot.slane %v1094_v35, 1 }
 0x206   :  { %v515_v47 = vadd.f32 %v514_v37, %v513_v34  ;;  %v566_v49 = vadd.f32 %v565_v42, %v564_v36  ;;  %v611_v42 = vrot.slane %v27_v31, 6 }
 0x208   :  { %v517_v51 = vadd.f32 %v516_v50, %v515_v47  ;;  %v568_v52 = vadd.f32 %v567_v26, %v566_v49  ;;  %662 = vmatpush.bf16.xpose.msrb.mxu1 %v644_v33  ;;  %v803_v26 = vmov 0   ;;  %v618_v50 = vrot.slane %v27_v31, 7 }
 0x209   :  { %772 = vset.pattern.permute.xlu0 %v803_v26 }
 0x20a   :  { %v519_v10 = vadd.f32 %v518_v7, %v517_v51  ;;  %v570_v59 = vadd.f32 %v569_v11, %v568_v52 }
 0x20c   :  { %v520_v25 = vrot.slane %v519_v10, 4  ;;  %v572_v27 = vadd.f32 %v571_v62, %v570_v59 }
 0x20e   :  { %v521_v28 = vadd.f32 %v520_v25, %v519_v10  ;;  %v573_v29 = vrot.slane %v572_v27, 4 }
 0x210   :  { %v522_v41 = vrot.slane %v521_v28, 2  ;;  %v574_v44 = vadd.f32 %v573_v29, %v572_v27  ;;  %663 = vmatpush.bf16.xpose.msrb.mxu1 %v641_v30 }
 0x212   :  { %v523_v6 = vadd.f32 %v522_v41, %v521_v28  ;;  %v575_v46 = vrot.slane %v574_v44, 2 }
 0x214   :  { %v524_v55 = vrot.slane %v523_v6, 1  ;;  %v576_v60 = vadd.f32 %v575_v46, %v574_v44 }
 0x216   :  { %v525_v57 = vadd.f32 %v524_v55, %v523_v6  ;;  %v577_v58 = vrot.slane %v576_v60, 1 }
 0x218   :  { %664 = vmatpush.bf16.xpose.msrb.mxu1 %v638_v61  ;;  %v578_v0 = vadd.f32 %v577_v58, %v576_v60  ;;  %v580_v1 = vsub.f32 %v525_v57, %v579_v4 }
 0x21a   :  { %v583_v2 = vsub.f32 %v578_v0, %v582_v63  ;;  %v584_v3 = vmul.f32 0.027027028, %v580_v1 }
 0x21c   :  { %v585_v8 = vmul.f32 0.027027028, %v583_v2  ;;  %v586_v48 = vmul.f32 %v584_v3, %v584_v3 }
 0x21e   :  { %v587_v40 = vsub.f32 %v585_v8, %v586_v48 }
 0x220   :  { %665 = vmatpush.bf16.xpose.msrb.mxu1 %v635_v43  ;;  %v588_v12 = vmax.f32 %v587_v40, 0.0 }
 0x222   :  { %v589_v13 = vadd.f32 1e-05, %v588_v12 }
 0x224   :  { %775 = vrsqrt.f32 %v589_v13  ;;  %vm596_vm7 = vweird.f32 %v589_v13 }
 0x22a   :  { %v776_v19 = vpop.eup %775 }
 0x22b   :  { %v591_v20 = vmul.f32 %v776_v19, %v589_v13  ;;  %vm597_vm6 = vweird.f32 %v776_v19 }
 0x22c   :  { %vm598_vm8 = vmor %vm596_vm7, %vm597_vm6 }
 0x22d   :  { %v592_v9 = vmul.f32 %v776_v19, %v591_v20 }
 0x22f   :  { %v593_v15 = vmul.f32 0.5, %v592_v9 }
 0x231   :  { %v594_v16 = vsub.f32 1.5, %v593_v15 }
 0x233   :  { %v595_v17 = vmul.f32 %v776_v19, %v594_v16 }
 0x235   :  { %v599_v32 = vsel %vm598_vm8, %v776_v19, %v595_v17 }
 0x236   :  { %v603_v22 = vmul.f32 %v601_v56, %v599_v32 }
 0x238   :  { %v609_v23 = vmul.f32 %v603_v22, %v27_v31  ;;  %v604_v24 = vmul.f32 %v603_v22, %v584_v3 }
 0x23a   :  { %v621_v34 = vperm.slane %v609_v23, 0  ;;  %v606_v36 = vrot.slane %v604_v24, 6 }
 0x23c   :  { %v622_v37 = vpack.c.bf16 %v621_v34, %v621_v34  ;;  %v608_v38 = vsub.f32 %v1094_v35, %v606_v36 }
 0x23e   :  { %757 = vmatmul.msk.bf16.vlgmr.msrb.gmra.mxu1 %vm488_vm5, %v622_v37  ;;  %v613_v47 = vmul.f32 %v611_v42, %v608_v38 }
 0x240   :  { %v615_v49 = vsel %vm614_vm9, %v613_v47, 0.0 }
 0x241   :  { %616 = vadd.xlane.f32.xlu0 %v615_v49 }
 0x2b4   :  { %v617_v21 = vpop.xlane.xlu0 %616 }
 0x2b5   :  { %v620_v33 = vadd.f32 %v618_v50, %v617_v21 }
 0x2b7   :  { %673 = vperm.xlu0 %772, %v620_v33  }
 0x2bb   :  { %v667_v51 = vpop.f32.mrf.mxu1 }
 0x2c3   :  { %v669_v52 = vpop.f32.mrf.mxu1 }
 0x329   :  { %v674_v11 = vpop.permute.xlu0 %673 }
 0x32a   :  { %v675_v35 = vrot.slane %v674_v11, 2 }
 0x32c   :  { %v677_v7 = vadd.f32 %v675_v35, %v667_v51 }
 0x32e   :  { %678 = vst [vmem:[#allocation2] sm:$0x1] %v677_v7 }
 0x32f   :  { %689 = dma.vmem_to_hbm [thread:$0]  %s685_s24, 16, %s687_s27, [#allocation3]  }
 0x330   :  { %801 = dma.done.wait [#allocation3], 16  }
 0x331   :  { %802 = vsyncadd [#allocation3], 4294967280 }
 0x332   :  { %694 = vsyncpa [#allocation3], 1 }

</bundles_post_ra>
